<compile_context>
chip_gen: v5e
topology: v5e:2x2
jax: 0.10.0
libtpu: 0.0.40
codegen_flags: <defaults>
</compile_context>

<pallas_src>
import jax
import jax.numpy as jnp
from jax.experimental import pallas as pl
from jax.experimental.pallas import tpu as pltpu

# Bicycle-model physical constants (from BicycleModel.__init__; no learnable params).
M_ = 1500.0
IZ = 3000.0
LF = 1.2
LR = 1.6
CF = 80000.0
CR = 80000.0
VX = 10.0

# Pre-folded, multiply-only constants (no runtime divides in the kernel).
K_F = CF / (M_ * VX)        # Fyf contribution to d_beta per unit alpha_f
K_R = CR / (M_ * VX)        # Fyr contribution to d_beta per unit alpha_r
LF_VX = LF / VX
LR_VX = LR / VX
CF_LF_IZ = CF * LF / IZ
CR_LR_IZ = CR * LR / IZ

_LANES = 128
_SUBL = 8


def _bicycle_kernel(x_ref, delta_ref, out_ref):
    # x_ref:     (3, tile_rows, 128)  -> beta, psi_dot, psi  (y stays in HBM)
    # delta_ref: (tile_rows, 128)
    # out_ref:   (4, tile_rows, 128)  -> d_beta, d_psi_dot, d_psi, d_y
    beta = x_ref[0]
    psi_dot = x_ref[1]
    psi = x_ref[2]
    delta = delta_ref[...]

    alpha_f = delta - (beta + LF_VX * psi_dot)
    alpha_r = LR_VX * psi_dot - beta     # == -(beta - LR*psi_dot/VX)

    # Direct lane-dense slab writes (no sublane concatenate / masked stores).
    out_ref[0] = K_F * alpha_f + K_R * alpha_r - psi_dot          # d_beta
    out_ref[1] = CF_LF_IZ * alpha_f - CR_LR_IZ * alpha_r          # d_psi_dot
    out_ref[2] = psi_dot                                          # d_psi
    out_ref[3] = VX * (beta + psi)                                # d_y


def _choose_tile_rows(rows):
    """Largest tile (multiple of 8, divisor of rows) <= 1024 rows.

    1024 rows -> ~8 MiB double-buffered working set (8 f32 slabs x 2 buffers),
    safe under v5e's 16 MiB default scoped VMEM and well under v6e/v7x limits.
    Prefers >= 2 grid steps when possible so the "parallel" axis can shard
    across both v7x TensorCores.
    """
    if rows <= _SUBL:
        return rows
    cap = 1024
    target = min(cap, rows // 2)                 # aim for >= 2 grid steps
    tr = max(_SUBL, (target // _SUBL) * _SUBL)   # multiple of 8
    while rows % tr != 0:
        tr -= _SUBL
    return tr


def bicycle_model_forward(x, delta):
    """x: (4, B) f32, delta: (B,) or (1, B) f32 -> (4, B) f32 [d_beta, d_psi_dot, d_psi, d_y]."""
    x = jnp.asarray(x, jnp.float32)
    delta = jnp.asarray(delta, jnp.float32).reshape(-1)
    assert x.shape[0] == 4 and x.shape[1] == delta.shape[0]
    B = x.shape[1]

    # Pad batch to a multiple of 8*128 so every slab is (8k, 128)-dense.
    chunk = _SUBL * _LANES
    B_pad = ((B + chunk - 1) // chunk) * chunk
    pad = B_pad - B
    if pad:
        x = jnp.pad(x, ((0, 0), (0, pad)))
        delta = jnp.pad(delta, (0, pad))
    rows = B_pad // _LANES

    # Free (layout-compatible) reshapes; no packing copy.
    x3 = x.reshape(4, rows, _LANES)
    d2 = delta.reshape(rows, _LANES)

    tile_rows = _choose_tile_rows(rows)
    grid = (rows // tile_rows,)

    out = pl.pallas_call(
        _bicycle_kernel,
        out_shape=jax.ShapeDtypeStruct((4, rows, _LANES), jnp.float32),
        grid=grid,
        in_specs=[
            # Only state rows 0..2 (beta, psi_dot, psi); the unused y row is
            # never DMA'd out of HBM.
            pl.BlockSpec((3, tile_rows, _LANES), lambda i: (0, i, 0)),
            pl.BlockSpec((tile_rows, _LANES), lambda i: (i, 0)),
        ],
        out_specs=pl.BlockSpec((4, tile_rows, _LANES), lambda i: (0, i, 0)),
        compiler_params=pltpu.CompilerParams(
            dimension_semantics=("parallel",)),
    )(x3, d2)

    return out.reshape(4, B_pad)[:, :B]


def _reference(x, delta):
    # Pure-JAX reference mirroring the PyTorch module; all operands are (B,).
    beta, psi_dot, psi, y = x
    alpha_f = delta - (beta + LF * psi_dot / VX)
    alpha_r = -(beta - LR * psi_dot / VX)
    fyf = CF * alpha_f
    fyr = CR * alpha_r
    d_beta = (fyf + fyr) / (M_ * VX) - psi_dot
    d_psi_dot = (LF * fyf - LR * fyr) / IZ
    d_psi = psi_dot
    d_y = VX * (beta + psi)
    return jnp.stack([d_beta, d_psi_dot, d_psi, d_y])


if __name__ == "__main__":
    key = jax.random.PRNGKey(0)
    kx, kd = jax.random.split(key)

    # Deliberately not a multiple of 1024 to exercise the padding path, while
    # still producing 2 grid steps (rows=16, tile_rows=8) after padding.
    B = 2000
    x = jax.random.normal(kx, (4, B), dtype=jnp.float32) * 0.1
    delta = jax.random.normal(kd, (B,), dtype=jnp.float32) * 0.05

    out = bicycle_model_forward(x, delta)
    out = jax.block_until_ready(out)

    ref = _reference(x, delta)
    assert out.shape == (4, B)
    assert jnp.allclose(out, ref, rtol=1e-5, atol=1e-4), "mismatch vs reference"

    print("KERNEL_OK")
</pallas_src>

<mosaic_0001>
module attributes {stable_mosaic.version = 11 : i64} {
  func.func @_bicycle_kernel(%arg0: i32, %arg1: memref<3x8x128xf32, #tpu.memory_space<vmem>>, %arg2: memref<8x128xf32, #tpu.memory_space<vmem>>, %arg3: memref<4x8x128xf32, #tpu.memory_space<vmem>>) attributes {dimension_semantics = [#tpu.dimension_semantics<parallel>], iteration_bounds = array<i64: 2>, scalar_prefetch = 0 : i64, scratch_operands = 0 : i64, tpu.core_type = #tpu.core_type<tc>, window_params = [{transform_indices = @transform_0, window_bounds = array<i64: 3, 8, 128>}, {transform_indices = @transform_1, window_bounds = array<i64: 8, 128>}, {transform_indices = @transform_2, window_bounds = array<i64: 4, 8, 128>}]} {
    %c0 = arith.constant 0 : index
    %c0_0 = arith.constant 0 : index
    %c0_1 = arith.constant 0 : index
    %0 = vector.load %arg1[%c0, %c0_0, %c0_1] : memref<3x8x128xf32, #tpu.memory_space<vmem>>, vector<1x8x128xf32>
    %1 = vector.shape_cast %0 : vector<1x8x128xf32> to vector<8x128xf32>
    %c1 = arith.constant 1 : index
    %c0_2 = arith.constant 0 : index
    %c0_3 = arith.constant 0 : index
    %2 = vector.load %arg1[%c1, %c0_2, %c0_3] : memref<3x8x128xf32, #tpu.memory_space<vmem>>, vector<1x8x128xf32>
    %3 = vector.shape_cast %2 : vector<1x8x128xf32> to vector<8x128xf32>
    %c2 = arith.constant 2 : index
    %c0_4 = arith.constant 0 : index
    %c0_5 = arith.constant 0 : index
    %4 = vector.load %arg1[%c2, %c0_4, %c0_5] : memref<3x8x128xf32, #tpu.memory_space<vmem>>, vector<1x8x128xf32>
    %5 = vector.shape_cast %4 : vector<1x8x128xf32> to vector<8x128xf32>
    %c0_6 = arith.constant 0 : index
    %c0_7 = arith.constant 0 : index
    %6 = vector.load %arg2[%c0_6, %c0_7] : memref<8x128xf32, #tpu.memory_space<vmem>>, vector<8x128xf32>
    %cst = arith.constant 1.200000e-01 : f32
    %7 = vector.broadcast %cst : f32 to vector<8x128xf32>
    %8 = arith.mulf %7, %3 : vector<8x128xf32>
    %9 = arith.addf %1, %8 : vector<8x128xf32>
    %10 = arith.subf %6, %9 : vector<8x128xf32>
    %cst_8 = arith.constant 1.600000e-01 : f32
    %11 = vector.broadcast %cst_8 : f32 to vector<8x128xf32>
    %12 = arith.mulf %11, %3 : vector<8x128xf32>
    %13 = arith.subf %12, %1 : vector<8x128xf32>
    %cst_9 = arith.constant 5.33333349 : f32
    %14 = vector.broadcast %cst_9 : f32 to vector<8x128xf32>
    %15 = arith.mulf %14, %10 : vector<8x128xf32>
    %cst_10 = arith.constant 5.33333349 : f32
    %16 = vector.broadcast %cst_10 : f32 to vector<8x128xf32>
    %17 = arith.mulf %16, %13 : vector<8x128xf32>
    %18 = arith.addf %15, %17 : vector<8x128xf32>
    %19 = arith.subf %18, %3 : vector<8x128xf32>
    %c0_11 = arith.constant 0 : index
    %c0_12 = arith.constant 0 : index
    %c0_13 = arith.constant 0 : index
    %20 = vector.load %arg3[%c0_11, %c0_12, %c0_13] : memref<4x8x128xf32, #tpu.memory_space<vmem>>, vector<1x8x128xf32>
    %21 = vector.shape_cast %20 : vector<1x8x128xf32> to vector<8x128xf32>
    %22 = vector.shape_cast %19 : vector<8x128xf32> to vector<1x8x128xf32>
    tpu.vector_store %arg3[%c0_11, %c0_12, %c0_13], %22 {strides = array<i32>} : memref<4x8x128xf32, #tpu.memory_space<vmem>>, vector<1x8x128xf32>,
    %cst_14 = arith.constant 3.200000e+01 : f32
    %23 = vector.broadcast %cst_14 : f32 to vector<8x128xf32>
    %24 = arith.mulf %23, %10 : vector<8x128xf32>
    %cst_15 = arith.constant 42.6666679 : f32
    %25 = vector.broadcast %cst_15 : f32 to vector<8x128xf32>
    %26 = arith.mulf %25, %13 : vector<8x128xf32>
    %27 = arith.subf %24, %26 : vector<8x128xf32>
    %c1_16 = arith.constant 1 : index
    %c0_17 = arith.constant 0 : index
    %c0_18 = arith.constant 0 : index
    %28 = vector.load %arg3[%c1_16, %c0_17, %c0_18] : memref<4x8x128xf32, #tpu.memory_space<vmem>>, vector<1x8x128xf32>
    %29 = vector.shape_cast %28 : vector<1x8x128xf32> to vector<8x128xf32>
    %30 = vector.shape_cast %27 : vector<8x128xf32> to vector<1x8x128xf32>
    tpu.vector_store %arg3[%c1_16, %c0_17, %c0_18], %30 {strides = array<i32>} : memref<4x8x128xf32, #tpu.memory_space<vmem>>, vector<1x8x128xf32>,
    %c2_19 = arith.constant 2 : index
    %c0_20 = arith.constant 0 : index
    %c0_21 = arith.constant 0 : index
    %31 = vector.load %arg3[%c2_19, %c0_20, %c0_21] : memref<4x8x128xf32, #tpu.memory_space<vmem>>, vector<1x8x128xf32>
    %32 = vector.shape_cast %31 : vector<1x8x128xf32> to vector<8x128xf32>
    %33 = vector.shape_cast %3 : vector<8x128xf32> to vector<1x8x128xf32>
    tpu.vector_store %arg3[%c2_19, %c0_20, %c0_21], %33 {strides = array<i32>} : memref<4x8x128xf32, #tpu.memory_space<vmem>>, vector<1x8x128xf32>,
    %34 = arith.addf %1, %5 : vector<8x128xf32>
    %cst_22 = arith.constant 1.000000e+01 : f32
    %35 = vector.broadcast %cst_22 : f32 to vector<8x128xf32>
    %36 = arith.mulf %35, %34 : vector<8x128xf32>
    %c3 = arith.constant 3 : index
    %c0_23 = arith.constant 0 : index
    %c0_24 = arith.constant 0 : index
    %37 = vector.load %arg3[%c3, %c0_23, %c0_24] : memref<4x8x128xf32, #tpu.memory_space<vmem>>, vector<1x8x128xf32>
    %38 = vector.shape_cast %37 : vector<1x8x128xf32> to vector<8x128xf32>
    %39 = vector.shape_cast %36 : vector<8x128xf32> to vector<1x8x128xf32>
    tpu.vector_store %arg3[%c3, %c0_23, %c0_24], %39 {strides = array<i32>} : memref<4x8x128xf32, #tpu.memory_space<vmem>>, vector<1x8x128xf32>,
    return
  }
  func.func @transform_0(%arg0: i32) -> (i32, i32, i32) {
    %c0_i32 = arith.constant 0 : i32
    %c0_i32_0 = arith.constant 0 : i32
    %c0_i32_1 = arith.constant 0 : i32
    return %c0_i32, %arg0, %c0_i32_0 : i32, i32, i32
  }
  func.func @transform_1(%arg0: i32) -> (i32, i32) {
    %c0_i32 = arith.constant 0 : i32
    %c0_i32_0 = arith.constant 0 : i32
    return %arg0, %c0_i32 : i32, i32
  }
  func.func @transform_2(%arg0: i32) -> (i32, i32, i32) {
    %c0_i32 = arith.constant 0 : i32
    %c0_i32_0 = arith.constant 0 : i32
    %c0_i32_1 = arith.constant 0 : i32
    return %c0_i32, %arg0, %c0_i32_0 : i32, i32, i32
  }
}

</mosaic_0001>

<bundles_post_ra>
// kernel: tpu_custom_call.1
= control target key start
LH: loop header
LB: loop body
LE: loop exit
PB: predicated region body
PF: predicated region fallthrough
CT: control target
= control target key end

     0   :  { %s729_s0 = inlined_call_operand.hbm [shape: f32[4,16,128], index: 0, kind: input, shape index: {}]   ;;  %s730_s1 = inlined_call_operand.hbm [shape: f32[16,128], index: 1, kind: input, shape index: {}]   ;;  %s731_s2 = inlined_call_operand.hbm [shape: f32[4,16,128], index: 2, kind: output, shape index: {}]  }
   0x1   :  { %732 = sst [smem:[#allocation11_spill]] %s729_s0 }
   0x2   :  { %7 = vsyncpa [#allocation3], 0 }
   0x3   :  { %9 = vsyncpa [#allocation3 + $0x1], 0 }
   0x4   :  { %10 = vsyncpa [#allocation6], 0 }
   0x5   :  { %12 = vsyncpa [#allocation6 + $0x1], 0 }
   0x6   :  { %13 = vsyncpa [#allocation4], 0 }
   0x7   :  { %15 = vsyncpa [#allocation4 + $0x1], 0  ;;  %s570_s9 = smov 0   ;;  %s572_s10 = smov 0  }
   0x8   :  { %s574_s11 = smov 0   ;;  %s576_s12 = smov 0  }
   0x9 LB: > { %s591_s13 = sadd.s32 4294967295, %s547_s12   ;;  %s340_s14 = sadd.s32 4294967294, %s547_s12   ;;  %s547_s12 = sphi %s576_s12, %s742_s12   ;;  %s543_s11 = sphi %s574_s11, %s741_s11   ;;  %s539_s10 = sphi %s572_s10, %s740_s10   ;;  %s535_s9 = sphi %s570_s9, %s739_s9  }
   0xa   : > { %s595_s15 = sadd.s32 1, %s547_s12   ;;  %s28_s16 = sadd.s32 1, %s543_s11 }
   0xb   : > { %s25_s17 = ssub.s32 %s547_s12, %s595_s15  ;;  %p35_p0 = scmp.ne.s32.totalorder %s543_s11, %s539_s10 }
   0xc   : > { %p26_p1 = scmp.eq.s32.totalorder %s25_s17, 0  ;;  %p36_p2 = scmp.eq.s32.totalorder %s547_s12, 0 }
   0xd   : > { %p41_p3 = scmp.ne.s32.totalorder %s539_s10, %s535_s9  ;;  %p42_p4 = scmp.eq.s32.totalorder %s591_s13, 0 }
   0xe   : > { %s607_s18 = scalar_select %p26_p1, %s543_s11, %s28_s16  }
   0xf   : > { %p37_p5 = por %p36_p2, %p35_p0  ;;  %p609_p6 = por %p42_p4, %p41_p3 }
  0x10   : > { %p91_p7 = scmp.eq.s32.totalorder %s591_s13, 1  ;;  %p97_p8 = scmp.eq.s32.totalorder %s340_s14, 1 }
  0x11   : > { %p342_p9 = scmp.ge.s32.totalorder %s547_s12, 2  ;;  %p377_p10 = scmp.lt.s32.totalorder %s547_s12, 2 }
  0x12   : > { %p616_p11 = por %p91_p7, %p35_p0  ;;  %p620_p12 = por %p97_p8, %p41_p3 }
  0x13   : > { %s625_s22 = sand.u32 1, %s543_s11   ;;  %s343_s23 = sshll.u32 %s547_s12, 3 }
  0x14   : > { %s358_s24 = smul.u32 24, %s625_s22  ;;  %s736_s0 = sld [smem:[#allocation11_spill]] }
  0x15   : > { %p634_p13 = pnand %p377_p10, %p37_p5  ;;  %p346_p0 = scmp.ge.s32.totalorder %s547_s12, 1 }
  0x16   : > { %s121_s30 = scalar_lea.vmem [#allocation2], %s358_s24  ;;  %s118_s4 = scalar_lea.sflag [#allocation3], %s625_s22 }
  0x17   : > { %s128_s3 = sshll.u32 %s121_s30, 4  ;;  %p421_p2 = pneg %p634_p13  ;;  %s129_s3 = int_to_ptr.vmem [resolvable:$true] %s128_s3 }
  0x1a   : > { %s125_s27 = scalar_lea.hbm %s736_s0, %s343_s23  ;;  %s424_s14 = scalar_lea.hbm %s736_s0, 64 }
  0x1b   : > { %s126_s29 = sshll.u32 %s125_s27, 4  ;;  %s127_s29 = int_to_ptr.hbm [resolvable:$true] %s126_s29 }
  0x1c   : > { %s417_s5 = sshra.s32 %s127_s29, 4  ;;  %s418_s5 = int_to_ptr.hbm [resolvable:$true] %s417_s5 }
  0x1d   : > { %s419_s6 = scalar_lea.hbm %s418_s5, 24  ;;  %p425_p5 = scmp.lt.s32.totalorder %s418_s5, %s736_s0 }
  0x1e   : > { %p420_p1 = scmp.ne.s32.totalorder %s418_s5, %s419_s6  ;;  %p426_p7 = scmp.lt.s32.totalorder %s424_s14, %s419_s6 }
  0x20   : > { %p422_p3 = pnand %p421_p2, %p420_p1  ;;  %p427_p8 = por %p426_p7, %p425_p5 }
  0x22   : > { %p423_p4 = pneg %p422_p3 }
  0x24   : > { %p428_p10 = pnand %p427_p8, %p423_p4 }
  0x26   : > { %431 = shalt.err (!%p428_p10)
}
  0x27   : > { %s549_s24 = smov 256   ;;  %s550_s25 = smov 128  }
  0x28   : > { %s551_s26 = smov 8   ;;  %p155_p1 = scmp.lt.s32.totalorder %s547_s12, 3 }
  0x29   : > { %369 = dma.hbm_to_vmem [thread:$0]  (!%p634_p13), %s127_s29, 384, %s129_s3, %s118_s4, %s549_s24, %s550_s25, %s551_s26  }
  0x2a   : > { %s344_s27 = sshll.u32 %s625_s22, 3  ;;  %s146_s6 = scalar_lea.hbm %s730_s1, %s343_s23 }
  0x2b   : > { %p662_p3 = pnand %p346_p0, %p155_p1  ;;  %s148_s8 = sshll.u32 %s146_s6, 4  ;;  %s149_s8 = int_to_ptr.hbm [resolvable:$true] %s148_s8 }
  0x2c   : > { %s142_s14 = scalar_lea.vmem [#allocation5], %s344_s27  ;;  %s139_s17 = scalar_lea.sflag [#allocation6], %s625_s22 }
  0x2d   : > { %s150_s16 = sshll.u32 %s142_s14, 4  ;;  %s447_s0 = sshra.s32 %s149_s8, 4  ;;  %s151_s16 = int_to_ptr.vmem [resolvable:$true] %s150_s16  ;;  %s448_s0 = int_to_ptr.hbm [resolvable:$true] %s447_s0 }
  0x2e   : > { %s449_s29 = scalar_lea.hbm %s448_s0, 8  ;;  %s454_s4 = scalar_lea.hbm %s730_s1, 16 }
  0x2f   : > { %p450_p4 = scmp.ne.s32.totalorder %s448_s0, %s449_s29  ;;  %p455_p0 = scmp.lt.s32.totalorder %s448_s0, %s730_s1 }
  0x30   : > { %p456_p8 = scmp.lt.s32.totalorder %s454_s4, %s449_s29 }
  0x31   : > { %p452_p5 = pnand %p450_p4, %p421_p2 }
  0x32   : > { %p457_p10 = por %p456_p8, %p455_p0 }
  0x33   : > { %p453_p7 = pneg %p452_p5 }
  0x35   : > { %p458_p1 = pnand %p457_p10, %p453_p7 }
  0x37   : > { %461 = shalt.err (!%p458_p1)
}
  0x38   : > { %372 = dma.hbm_to_vmem [thread:$0]  (!%p634_p13), %s149_s8, 128, %s151_s16, %s139_s17  }
  0x39   : > { %159 = sbr.rel (%p662_p3) target bundleno = 84 (0x54), region = 28  ;;  %s681_s22 = sand.u32 (!%p662_p3), 1, %s539_s10  }
  0x3a   : > { %s359_s26 = smul.u32 (!%p662_p3), 24, %s681_s22  ;;  %s162_s27 = scalar_lea.sflag (!%p662_p3), [#allocation3], %s681_s22 }
  0x3c   : > { %s165_s30 = scalar_lea.vmem (!%p662_p3), [#allocation2], %s359_s26 }
  0x3e   : > { %522 = dma.done.wait (%p609_p6), %s162_s27, 384  }
  0x3f   : > { %524 = vsyncadd (%p609_p6), %s162_s27, 4294966912  ;;  %s347_s0 = sshll.u32 %s681_s22, 3  ;;  %s172_s28 = scalar_lea.sflag [#allocation6], %s681_s22 }
  0x40   : > { %s175_s5 = scalar_lea.vmem [#allocation5], %s347_s0 }
  0x41   : > { %526 = dma.done.wait (%p609_p6), %s172_s28, 128  }
  0x42   : > { %528 = vsyncadd (%p609_p6), %s172_s28, 4294967168  ;;  %s348_s6 = sshll.u32 %s681_s22, 5  ;;  %v202_v0 = vld [vmem:[%s165_s30] sm:$0xff]  ;;  %v349_v1 = vld [vmem:[%s165_s30 + $0x8] sm:$0xff]  ;;  %s355_s7 = sshll.u32 %s591_s13, 3 }
  0x43   : > { %v208_v2 = vmul.f32 0.12, %v349_v1  ;;  %v211_v3 = vmul.f32 0.16, %v349_v1  ;;  %s201_s8 = scalar_lea.vmem [#allocation7], %s348_s6  ;;  %v350_v4 = vld [vmem:[%s165_s30 + $0x10] sm:$0xff]  ;;  %s240_s19 = scalar_lea.hbm %s731_s2, %s355_s7 }
  0x44   : > { %352 = vst [vmem:[%s201_s8 + $0x10] sm:$0xff] %v349_v1  ;;  %v207_v5 = vld [vmem:[%s175_s5] sm:$0xff]  ;;  %v225_v6 = vadd.f32 %v350_v4, %v202_v0  ;;  %s241_s17 = sshll.u32 %s201_s8, 4  ;;  %s243_s13 = sshll.u32 %s240_s19, 4  ;;  %s242_s17 = int_to_ptr.vmem [resolvable:$true] %s241_s17  ;;  %s244_s13 = int_to_ptr.hbm [resolvable:$true] %s243_s13 }
  0x45   : > { %v209_v7 = vadd.f32 %v208_v2, %v202_v0  ;;  %v212_v8 = vsub.f32 %v211_v3, %v202_v0  ;;  %s230_s29 = scalar_lea.sflag [#allocation4], %s681_s22  ;;  %s491_s23 = sshra.s32 %s244_s13, 4  ;;  %s492_s23 = int_to_ptr.hbm [resolvable:$true] %s491_s23 }
  0x46   : > { %v226_v9 = vmul.f32 10.0, %v225_v6  ;;  %s493_s3 = scalar_lea.hbm %s492_s23, 32  ;;  %s497_s25 = scalar_lea.hbm %s731_s2, 64 }
  0x47   : > { %v210_v10 = vsub.f32 %v207_v5, %v209_v7  ;;  %v214_v11 = vmul.f32 5.3333335, %v212_v8  ;;  %v219_v12 = vmul.f32 42.666668, %v212_v8  ;;  %p494_p6 = scmp.ne.s32.totalorder %s492_s23, %s493_s3  ;;  %p498_p3 = scmp.lt.s32.totalorder %s492_s23, %s731_s2 }
  0x48   : > { %353 = vst [vmem:[%s201_s8 + $0x18] sm:$0xff] %v226_v9  ;;  %p499_p4 = scmp.lt.s32.totalorder %s497_s25, %s493_s3 }
  0x49   : > { %v213_v13 = vmul.f32 5.3333335, %v210_v10  ;;  %v218_v14 = vmul.f32 32.0, %v210_v10  ;;  %p495_p13 = pnand %p494_p6, %p616_p11 }
  0x4a   : > { %p500_p5 = por %p499_p4, %p498_p3 }
  0x4b   : > { %v215_v15 = vadd.f32 %v214_v11, %v213_v13  ;;  %v220_v16 = vsub.f32 %v218_v14, %v219_v12  ;;  %p496_p2 = pneg %p495_p13 }
  0x4d   : > { %v216_v17 = vsub.f32 %v215_v15, %v349_v1  ;;  %351 = vst [vmem:[%s201_s8 + $0x8] sm:$0xff] %v220_v16  ;;  %p501_p7 = pnand %p500_p5, %p496_p2 }
  0x4f   : > { %217 = vst [vmem:[%s201_s8] sm:$0xff] %v216_v17 }
  0x50   : > { %504 = shalt.err (!%p501_p7)
}
  0x51   : > { %s552_s22 = smov 128   ;;  %s553_s30 = smov 256  }
  0x52   : > { %s554_s0 = smov 8  }
  0x53   : > { %364 = dma.vmem_to_hbm [thread:$0]  (%p616_p11), %s242_s17, 512, %s244_s13, %s230_s29, %s552_s22, %s553_s30, %s554_s0  }
  0x54 PF: > { %s258_s28 = sand.u32 1, %s535_s9   ;;  %p374_p0 = pnand %p342_p9, %p620_p12 }
  0x55   : > { %s259_s5 = scalar_lea.sflag [#allocation4], %s258_s28 }
  0x56   : > { %p375_p8 = pneg %p374_p0 }
  0x58   : > { %530 = dma.done.wait (%p375_p8), %s259_s5, 512  }
  0x59   : > { %532 = vsyncadd (%p375_p8), %s259_s5, 4294966784  ;;  %p18_p10 = scmp.ge.s32.totalorder %s595_s15, 4   ;;  %s739_s9 = smov %s539_s10 }
  0x5a   : > { %s740_s10 = smov %s543_s11  ;;  %s741_s11 = smov %s607_s18 }
  0x5b   : > { %s742_s12 = smov %s595_s15  ;;  %20 = sbr.rel (!%p18_p10) target bundleno = 9 (0x9), region = 91 }
  0x60   :  { %265 = vsyncpa [#allocation3], 1 }
  0x61   :  { %267 = vsyncpa [#allocation3 + $0x1], 1 }
  0x62   :  { %268 = vsyncpa [#allocation6], 1 }
  0x63   :  { %270 = vsyncpa [#allocation6 + $0x1], 1 }
  0x64   :  { %271 = vsyncpa [#allocation4], 1 }
  0x65   :  { %273 = vsyncpa [#allocation4 + $0x1], 1 }

</bundles_post_ra>
